<compile_context>
chip_gen: v5e
topology: v5e:2x2
jax: 0.10.0
libtpu: 0.0.40
codegen_flags: <defaults>
</compile_context>

<pallas_src>
import math
import numpy as np
import jax
import jax.numpy as jnp
from jax.experimental import pallas as pl
from jax.experimental.pallas import tpu as pltpu


# ----------------------------------------------------------------------------- weights
def make_dct_weight_np():
    """Deterministic DCT basis, identical to DCT_Layer.init_DCT.

    Returns Wm (16, 16) with Wm[i*4 + j, oc] == conv_weight[oc, 0, i, j].
    """
    PI = math.pi
    DCT_kernel = np.zeros((4, 4, 1, 16), dtype=np.float32)
    u = np.ones([4], dtype=np.float32) * math.sqrt(2.0 / 4.0)
    u[0] = math.sqrt(1.0 / 4.0)
    for i in range(4):
        for j in range(4):
            for k in range(4):
                for l in range(4):
                    DCT_kernel[i, j, :, k * 4 + l] = (
                        u[k] * u[l]
                        * math.cos(PI / 8.0 * k * (2 * i + 1))
                        * math.cos(PI / 8.0 * l * (2 * j + 1))
                    )
    return DCT_kernel[:, :, 0, :].reshape(16, 16)


def _round_up(a, b):
    return (a + b - 1) // b * b


def _pick_row_tile(h):
    """Row-tile height: multiple of 8 dividing H (prefer 16), else the full H."""
    for t in (16, 8):
        if h % t == 0:
            return t
    return h  # pathological H: single (full-height) tile -- still a legal block


def _make_band(wm_np, t_rows, k_rows):
    """Banded weight matrix (16*t_rows, 4*k_rows).

    band[oc*t_rows + h, j*k_rows + p] = w[oc, 0, p - h, j]  if 0 <= p - h <= 3 else 0,
    with w[oc, 0, i, j] == wm_np[i*4 + j, oc] (exact PyTorch weights, no refactoring).
    """
    w = wm_np.reshape(4, 4, 16)  # w[i, j, oc]
    band = np.zeros((16 * t_rows, 4 * k_rows), dtype=np.float32)
    for oc in range(16):
        for h in range(t_rows):
            for j in range(4):
                for i in range(4):
                    band[oc * t_rows + h, j * k_rows + h + i] = w[i, j, oc]
    return band


# ----------------------------------------------------------------------------- kernel
def _make_kernel(t_rows, k_rows, width, num_r):
    def kernel(img_ref, band_ref, o_ref):
        # img_ref : (rows_total, W+3)        padded image for this (n, c), VMEM resident
        # band_ref: (16*t_rows, 4*k_rows)    banded DCT weights, VMEM resident
        # o_ref   : (16, t_rows, W)          16 DCT channels for this row tile
        if num_r == 1:
            r0 = 0
        else:
            r0 = pl.program_id(1) * t_rows
            if t_rows % 8 == 0:
                r0 = pl.multiple_of(r0, 8)

        # 4 width-tap slabs of the resident padded image.  Height taps are encoded in
        # the band matrix (sublane direction), so no staging scratch is needed; the
        # lane offsets j=0..3 are the only misaligned accesses (XLU rotates).
        slabs = [img_ref[pl.ds(r0, k_rows), pl.ds(j, width)] for j in range(4)]
        rhs = jnp.concatenate(slabs, axis=0)  # (4*k_rows, W), k_rows % 8 == 0 -> aligned

        # Single MXU contraction (accumulation over all 16 taps happens in the MXU),
        # fused abs + truncation at 8 on the VPU.
        y = jnp.dot(band_ref[...], rhs, preferred_element_type=jnp.float32)
        y = jnp.minimum(jnp.abs(y), 8.0)

        # Scatter the (16*t_rows, W) result into the (16, t_rows, W) output block.
        # Slices start at multiples of t_rows (multiple of 8) -> aligned vreg picks.
        for oc in range(16):
            o_ref[oc, :, :] = y[oc * t_rows:(oc + 1) * t_rows, :].astype(o_ref.dtype)

    return kernel


# ----------------------------------------------------------------------------- wrapper
def dct_layer(x, wm_np=None):
    """x: (N, C, H, W) float32.  Returns (N, 16*C, H, W), matching DCT_Layer.forward."""
    if wm_np is None:
        wm_np = make_dct_weight_np()
    N, C, H, W = x.shape
    x = x.astype(jnp.float32)
    NC = N * C

    t_rows = _pick_row_tile(H)
    num_r = H // t_rows
    k_rows = _round_up(t_rows + 3, 8)          # slab depth per width tap (>= t_rows+3)
    rows_total = (num_r - 1) * t_rows + k_rows  # padded-image height the kernel reads
    bot = rows_total - H - 1                    # >= 2 -> covers the conv's bottom pad;
                                                # extra rows are explicit zeros, so the
                                                # zero band entries never touch garbage.

    # ---- glue: pure data movement only (no 16x / 4x im2col intermediates) ----------
    x_pad = jnp.pad(x, ((0, 0), (0, 0), (1, bot), (1, 2))).reshape(NC, rows_total, W + 3)
    band = jnp.asarray(_make_band(wm_np, t_rows, k_rows))  # (16*t_rows, 4*k_rows)

    # ---- honest VMEM accounting (sublane/lane padding + double buffering) ----------
    img_block = _round_up(rows_total, 8) * _round_up(W + 3, 128) * 4
    band_block = _round_up(16 * t_rows, 8) * _round_up(4 * k_rows, 128) * 4
    out_block = 16 * _round_up(t_rows, 8) * _round_up(W, 128) * 4
    rhs_tmp = 4 * k_rows * _round_up(W, 128) * 4
    needed = 2 * (img_block + band_block + out_block) + out_block + rhs_tmp
    vmem_limit = int(min(max(needed + (4 << 20), 32 << 20), 64 << 20))

    cost = pl.CostEstimate(
        flops=2 * NC * num_r * (16 * t_rows) * (4 * k_rows) * W,
        transcendentals=0,
        bytes_accessed=int(x_pad.size * 4 + band.size * 4 + NC * 16 * H * W * 4),
    )

    out = pl.pallas_call(
        _make_kernel(t_rows, k_rows, W, num_r),
        out_shape=jax.ShapeDtypeStruct((NC, 16, H, W), jnp.float32),
        grid_spec=pltpu.PrefetchScalarGridSpec(
            num_scalar_prefetch=0,
            grid=(NC, num_r),
            in_specs=[
                # Whole padded image per (n, c); block index constant in r ->
                # DMA'd once per image, reused across all row tiles (~4 B/px HBM).
                pl.BlockSpec((None, rows_total, W + 3), lambda b, r: (b, 0, 0)),
                # Tiny banded weight, VMEM-resident (constant block index).
                pl.BlockSpec((16 * t_rows, 4 * k_rows), lambda b, r: (0, 0)),
            ],
            out_specs=pl.BlockSpec((None, 16, t_rows, W), lambda b, r: (b, 0, r, 0)),
        ),
        compiler_params=pltpu.CompilerParams(
            # Both axes are independent (distinct output blocks, read-only inputs),
            # so both are parallel -> v7x's two TensorCores usable even at small N*C.
            dimension_semantics=("parallel", "parallel"),
            vmem_limit_bytes=vmem_limit,
        ),
        cost_estimate=cost,
    )(x_pad, band)

    # (N*C, 16, H, W) is already channel-major: metadata-only reshape, no copy pass.
    return out.reshape(N, C * 16, H, W)


# ----------------------------------------------------------------------------- reference
def dct_layer_reference(x, wm):
    """Pure-JAX reference mirroring the PyTorch forward exactly."""
    N, C, H, W = x.shape
    wconv = jnp.transpose(wm.reshape(4, 4, 16), (2, 0, 1))[:, None, :, :]  # OIHW (16,1,4,4)
    outs = []
    for i in range(C):
        o = jax.lax.conv_general_dilated(
            x[:, i:i + 1], wconv, window_strides=(1, 1),
            padding=[(2, 2), (2, 2)],
            dimension_numbers=("NCHW", "OIHW", "NCHW"))
        o = jnp.minimum(jnp.abs(o), 8.0)   # DCT_Trunc(abs(.))
        outs.append(o)
    outs = jnp.concatenate(outs, axis=1)
    return outs[:, :, 1:, 1:]              # F.pad([-1, 0, -1, 0])


if __name__ == "__main__":
    key = jax.random.PRNGKey(0)
    N, C, H, W = 2, 4, 16, 16
    x = jax.random.normal(key, (N, C, H, W), dtype=jnp.float32) * 16.0  # exercise the clamp

    wm_np = make_dct_weight_np()
    wm = jnp.asarray(wm_np)

    out = jax.block_until_ready(dct_layer(x, wm_np))
    ref = jax.block_until_ready(dct_layer_reference(x, wm))

    assert out.shape == (N, 16 * C, H, W), out.shape
    np.testing.assert_allclose(np.asarray(out), np.asarray(ref), rtol=1e-5, atol=5e-5)

    print("KERNEL_OK")
</pallas_src>

<mosaic_0001>
module attributes {stable_mosaic.version = 11 : i64} {
  func.func @kernel(%arg0: i32, %arg1: i32, %arg2: memref<1x24x19xf32, #tpu.memory_space<vmem>>, %arg3: memref<256x96xf32, #tpu.memory_space<vmem>>, %arg4: memref<1x16x16x16xf32, #tpu.memory_space<vmem>>) attributes {dimension_semantics = [#tpu.dimension_semantics<parallel>, #tpu.dimension_semantics<parallel>], iteration_bounds = array<i64: 8, 1>, scalar_prefetch = 0 : i64, scratch_operands = 0 : i64, tpu.core_type = #tpu.core_type<tc>, window_params = [{transform_indices = @transform_0, window_bounds = array<i64: 1, 24, 19>}, {pipeline_mode = #tpu.pipeline_mode<synchronous>, transform_indices = @transform_1, window_bounds = array<i64: 256, 96>}, {transform_indices = @transform_2, window_bounds = array<i64: 1, 16, 16, 16>}]} {
    %c0 = arith.constant 0 : index
    %c0_0 = arith.constant 0 : index
    %c0_1 = arith.constant 0 : index
    %0 = vector.load %arg2[%c0, %c0_0, %c0_1] : memref<1x24x19xf32, #tpu.memory_space<vmem>>, vector<1x24x16xf32>
    %1 = vector.shape_cast %0 : vector<1x24x16xf32> to vector<24x16xf32>
    %c0_2 = arith.constant 0 : index
    %c0_3 = arith.constant 0 : index
    %c1 = arith.constant 1 : index
    %2 = vector.load %arg2[%c0_2, %c0_3, %c1] : memref<1x24x19xf32, #tpu.memory_space<vmem>>, vector<1x24x16xf32>
    %3 = vector.shape_cast %2 : vector<1x24x16xf32> to vector<24x16xf32>
    %c0_4 = arith.constant 0 : index
    %c0_5 = arith.constant 0 : index
    %c2 = arith.constant 2 : index
    %4 = vector.load %arg2[%c0_4, %c0_5, %c2] : memref<1x24x19xf32, #tpu.memory_space<vmem>>, vector<1x24x16xf32>
    %5 = vector.shape_cast %4 : vector<1x24x16xf32> to vector<24x16xf32>
    %c0_6 = arith.constant 0 : index
    %c0_7 = arith.constant 0 : index
    %c3 = arith.constant 3 : index
    %6 = vector.load %arg2[%c0_6, %c0_7, %c3] : memref<1x24x19xf32, #tpu.memory_space<vmem>>, vector<1x24x16xf32>
    %7 = vector.shape_cast %6 : vector<1x24x16xf32> to vector<24x16xf32>
    %8 = tpu.concatenate %1, %3, %5, %7 in 0 : vector<24x16xf32>, vector<24x16xf32>, vector<24x16xf32>, vector<24x16xf32> -> vector<96x16xf32>
    %c0_8 = arith.constant 0 : index
    %c0_9 = arith.constant 0 : index
    %9 = vector.load %arg3[%c0_8, %c0_9] : memref<256x96xf32, #tpu.memory_space<vmem>>, vector<256x96xf32>
    %cst = arith.constant dense<0.000000e+00> : vector<256x16xf32>
    %10 = tpu.matmul %9, %8, %cst {dimension_numbers = #tpu.dot_dimension_numbers<[1], [0], [0], [1], [0, 0, 1, 1], [], []>} : vector<256x96xf32>, vector<96x16xf32>, vector<256x16xf32> -> vector<256x16xf32>
    %11 = math.absf %10 : vector<256x16xf32>
    %cst_10 = arith.constant 8.000000e+00 : f32
    %12 = vector.broadcast %cst_10 : f32 to vector<256x16xf32>
    %13 = arith.minimumf %11, %12 : vector<256x16xf32>
    %14 = vector.extract_strided_slice %13 {offsets = [0, 0], sizes = [16, 16], strides = [1, 1]} : vector<256x16xf32> to vector<16x16xf32>
    %c0_11 = arith.constant 0 : index
    %c0_12 = arith.constant 0 : index
    %c0_13 = arith.constant 0 : index
    %c0_14 = arith.constant 0 : index
    %15 = vector.load %arg4[%c0_11, %c0_12, %c0_13, %c0_14] : memref<1x16x16x16xf32, #tpu.memory_space<vmem>>, vector<1x1x16x16xf32>
    %16 = vector.shape_cast %15 : vector<1x1x16x16xf32> to vector<16x16xf32>
    %17 = vector.shape_cast %14 : vector<16x16xf32> to vector<1x1x16x16xf32>
    tpu.vector_store %arg4[%c0_11, %c0_12, %c0_13, %c0_14], %17 {strides = array<i32>} : memref<1x16x16x16xf32, #tpu.memory_space<vmem>>, vector<1x1x16x16xf32>,
    %18 = vector.extract_strided_slice %13 {offsets = [16, 0], sizes = [16, 16], strides = [1, 1]} : vector<256x16xf32> to vector<16x16xf32>
    %c0_15 = arith.constant 0 : index
    %c1_16 = arith.constant 1 : index
    %c0_17 = arith.constant 0 : index
    %c0_18 = arith.constant 0 : index
    %19 = vector.load %arg4[%c0_15, %c1_16, %c0_17, %c0_18] : memref<1x16x16x16xf32, #tpu.memory_space<vmem>>, vector<1x1x16x16xf32>
    %20 = vector.shape_cast %19 : vector<1x1x16x16xf32> to vector<16x16xf32>
    %21 = vector.shape_cast %18 : vector<16x16xf32> to vector<1x1x16x16xf32>
    tpu.vector_store %arg4[%c0_15, %c1_16, %c0_17, %c0_18], %21 {strides = array<i32>} : memref<1x16x16x16xf32, #tpu.memory_space<vmem>>, vector<1x1x16x16xf32>,
    %22 = vector.extract_strided_slice %13 {offsets = [32, 0], sizes = [16, 16], strides = [1, 1]} : vector<256x16xf32> to vector<16x16xf32>
    %c0_19 = arith.constant 0 : index
    %c2_20 = arith.constant 2 : index
    %c0_21 = arith.constant 0 : index
    %c0_22 = arith.constant 0 : index
    %23 = vector.load %arg4[%c0_19, %c2_20, %c0_21, %c0_22] : memref<1x16x16x16xf32, #tpu.memory_space<vmem>>, vector<1x1x16x16xf32>
    %24 = vector.shape_cast %23 : vector<1x1x16x16xf32> to vector<16x16xf32>
    %25 = vector.shape_cast %22 : vector<16x16xf32> to vector<1x1x16x16xf32>
    tpu.vector_store %arg4[%c0_19, %c2_20, %c0_21, %c0_22], %25 {strides = array<i32>} : memref<1x16x16x16xf32, #tpu.memory_space<vmem>>, vector<1x1x16x16xf32>,
    %26 = vector.extract_strided_slice %13 {offsets = [48, 0], sizes = [16, 16], strides = [1, 1]} : vector<256x16xf32> to vector<16x16xf32>
    %c0_23 = arith.constant 0 : index
    %c3_24 = arith.constant 3 : index
    %c0_25 = arith.constant 0 : index
    %c0_26 = arith.constant 0 : index
    %27 = vector.load %arg4[%c0_23, %c3_24, %c0_25, %c0_26] : memref<1x16x16x16xf32, #tpu.memory_space<vmem>>, vector<1x1x16x16xf32>
    %28 = vector.shape_cast %27 : vector<1x1x16x16xf32> to vector<16x16xf32>
    %29 = vector.shape_cast %26 : vector<16x16xf32> to vector<1x1x16x16xf32>
    tpu.vector_store %arg4[%c0_23, %c3_24, %c0_25, %c0_26], %29 {strides = array<i32>} : memref<1x16x16x16xf32, #tpu.memory_space<vmem>>, vector<1x1x16x16xf32>,
    %30 = vector.extract_strided_slice %13 {offsets = [64, 0], sizes = [16, 16], strides = [1, 1]} : vector<256x16xf32> to vector<16x16xf32>
    %c0_27 = arith.constant 0 : index
    %c4 = arith.constant 4 : index
    %c0_28 = arith.constant 0 : index
    %c0_29 = arith.constant 0 : index
    %31 = vector.load %arg4[%c0_27, %c4, %c0_28, %c0_29] : memref<1x16x16x16xf32, #tpu.memory_space<vmem>>, vector<1x1x16x16xf32>
    %32 = vector.shape_cast %31 : vector<1x1x16x16xf32> to vector<16x16xf32>
    %33 = vector.shape_cast %30 : vector<16x16xf32> to vector<1x1x16x16xf32>
    tpu.vector_store %arg4[%c0_27, %c4, %c0_28, %c0_29], %33 {strides = array<i32>} : memref<1x16x16x16xf32, #tpu.memory_space<vmem>>, vector<1x1x16x16xf32>,
    %34 = vector.extract_strided_slice %13 {offsets = [80, 0], sizes = [16, 16], strides = [1, 1]} : vector<256x16xf32> to vector<16x16xf32>
    %c0_30 = arith.constant 0 : index
    %c5 = arith.constant 5 : index
    %c0_31 = arith.constant 0 : index
    %c0_32 = arith.constant 0 : index
    %35 = vector.load %arg4[%c0_30, %c5, %c0_31, %c0_32] : memref<1x16x16x16xf32, #tpu.memory_space<vmem>>, vector<1x1x16x16xf32>
    %36 = vector.shape_cast %35 : vector<1x1x16x16xf32> to vector<16x16xf32>
    %37 = vector.shape_cast %34 : vector<16x16xf32> to vector<1x1x16x16xf32>
    tpu.vector_store %arg4[%c0_30, %c5, %c0_31, %c0_32], %37 {strides = array<i32>} : memref<1x16x16x16xf32, #tpu.memory_space<vmem>>, vector<1x1x16x16xf32>,
    %38 = vector.extract_strided_slice %13 {offsets = [96, 0], sizes = [16, 16], strides = [1, 1]} : vector<256x16xf32> to vector<16x16xf32>
    %c0_33 = arith.constant 0 : index
    %c6 = arith.constant 6 : index
    %c0_34 = arith.constant 0 : index
    %c0_35 = arith.constant 0 : index
    %39 = vector.load %arg4[%c0_33, %c6, %c0_34, %c0_35] : memref<1x16x16x16xf32, #tpu.memory_space<vmem>>, vector<1x1x16x16xf32>
    %40 = vector.shape_cast %39 : vector<1x1x16x16xf32> to vector<16x16xf32>
    %41 = vector.shape_cast %38 : vector<16x16xf32> to vector<1x1x16x16xf32>
    tpu.vector_store %arg4[%c0_33, %c6, %c0_34, %c0_35], %41 {strides = array<i32>} : memref<1x16x16x16xf32, #tpu.memory_space<vmem>>, vector<1x1x16x16xf32>,
    %42 = vector.extract_strided_slice %13 {offsets = [112, 0], sizes = [16, 16], strides = [1, 1]} : vector<256x16xf32> to vector<16x16xf32>
    %c0_36 = arith.constant 0 : index
    %c7 = arith.constant 7 : index
    %c0_37 = arith.constant 0 : index
    %c0_38 = arith.constant 0 : index
    %43 = vector.load %arg4[%c0_36, %c7, %c0_37, %c0_38] : memref<1x16x16x16xf32, #tpu.memory_space<vmem>>, vector<1x1x16x16xf32>
    %44 = vector.shape_cast %43 : vector<1x1x16x16xf32> to vector<16x16xf32>
    %45 = vector.shape_cast %42 : vector<16x16xf32> to vector<1x1x16x16xf32>
    tpu.vector_store %arg4[%c0_36, %c7, %c0_37, %c0_38], %45 {strides = array<i32>} : memref<1x16x16x16xf32, #tpu.memory_space<vmem>>, vector<1x1x16x16xf32>,
    %46 = vector.extract_strided_slice %13 {offsets = [128, 0], sizes = [16, 16], strides = [1, 1]} : vector<256x16xf32> to vector<16x16xf32>
    %c0_39 = arith.constant 0 : index
    %c8 = arith.constant 8 : index
    %c0_40 = arith.constant 0 : index
    %c0_41 = arith.constant 0 : index
    %47 = vector.load %arg4[%c0_39, %c8, %c0_40, %c0_41] : memref<1x16x16x16xf32, #tpu.memory_space<vmem>>, vector<1x1x16x16xf32>
    %48 = vector.shape_cast %47 : vector<1x1x16x16xf32> to vector<16x16xf32>
    %49 = vector.shape_cast %46 : vector<16x16xf32> to vector<1x1x16x16xf32>
    tpu.vector_store %arg4[%c0_39, %c8, %c0_40, %c0_41], %49 {strides = array<i32>} : memref<1x16x16x16xf32, #tpu.memory_space<vmem>>, vector<1x1x16x16xf32>,
    %50 = vector.extract_strided_slice %13 {offsets = [144, 0], sizes = [16, 16], strides = [1, 1]} : vector<256x16xf32> to vector<16x16xf32>
    %c0_42 = arith.constant 0 : index
    %c9 = arith.constant 9 : index
    %c0_43 = arith.constant 0 : index
    %c0_44 = arith.constant 0 : index
    %51 = vector.load %arg4[%c0_42, %c9, %c0_43, %c0_44] : memref<1x16x16x16xf32, #tpu.memory_space<vmem>>, vector<1x1x16x16xf32>
    %52 = vector.shape_cast %51 : vector<1x1x16x16xf32> to vector<16x16xf32>
    %53 = vector.shape_cast %50 : vector<16x16xf32> to vector<1x1x16x16xf32>
    tpu.vector_store %arg4[%c0_42, %c9, %c0_43, %c0_44], %53 {strides = array<i32>} : memref<1x16x16x16xf32, #tpu.memory_space<vmem>>, vector<1x1x16x16xf32>,
    %54 = vector.extract_strided_slice %13 {offsets = [160, 0], sizes = [16, 16], strides = [1, 1]} : vector<256x16xf32> to vector<16x16xf32>
    %c0_45 = arith.constant 0 : index
    %c10 = arith.constant 10 : index
    %c0_46 = arith.constant 0 : index
    %c0_47 = arith.constant 0 : index
    %55 = vector.load %arg4[%c0_45, %c10, %c0_46, %c0_47] : memref<1x16x16x16xf32, #tpu.memory_space<vmem>>, vector<1x1x16x16xf32>
    %56 = vector.shape_cast %55 : vector<1x1x16x16xf32> to vector<16x16xf32>
    %57 = vector.shape_cast %54 : vector<16x16xf32> to vector<1x1x16x16xf32>
    tpu.vector_store %arg4[%c0_45, %c10, %c0_46, %c0_47], %57 {strides = array<i32>} : memref<1x16x16x16xf32, #tpu.memory_space<vmem>>, vector<1x1x16x16xf32>,
    %58 = vector.extract_strided_slice %13 {offsets = [176, 0], sizes = [16, 16], strides = [1, 1]} : vector<256x16xf32> to vector<16x16xf32>
    %c0_48 = arith.constant 0 : index
    %c11 = arith.constant 11 : index
    %c0_49 = arith.constant 0 : index
    %c0_50 = arith.constant 0 : index
    %59 = vector.load %arg4[%c0_48, %c11, %c0_49, %c0_50] : memref<1x16x16x16xf32, #tpu.memory_space<vmem>>, vector<1x1x16x16xf32>
    %60 = vector.shape_cast %59 : vector<1x1x16x16xf32> to vector<16x16xf32>
    %61 = vector.shape_cast %58 : vector<16x16xf32> to vector<1x1x16x16xf32>
    tpu.vector_store %arg4[%c0_48, %c11, %c0_49, %c0_50], %61 {strides = array<i32>} : memref<1x16x16x16xf32, #tpu.memory_space<vmem>>, vector<1x1x16x16xf32>,
    %62 = vector.extract_strided_slice %13 {offsets = [192, 0], sizes = [16, 16], strides = [1, 1]} : vector<256x16xf32> to vector<16x16xf32>
    %c0_51 = arith.constant 0 : index
    %c12 = arith.constant 12 : index
    %c0_52 = arith.constant 0 : index
    %c0_53 = arith.constant 0 : index
    %63 = vector.load %arg4[%c0_51, %c12, %c0_52, %c0_53] : memref<1x16x16x16xf32, #tpu.memory_space<vmem>>, vector<1x1x16x16xf32>
    %64 = vector.shape_cast %63 : vector<1x1x16x16xf32> to vector<16x16xf32>
    %65 = vector.shape_cast %62 : vector<16x16xf32> to vector<1x1x16x16xf32>
    tpu.vector_store %arg4[%c0_51, %c12, %c0_52, %c0_53], %65 {strides = array<i32>} : memref<1x16x16x16xf32, #tpu.memory_space<vmem>>, vector<1x1x16x16xf32>,
    %66 = vector.extract_strided_slice %13 {offsets = [208, 0], sizes = [16, 16], strides = [1, 1]} : vector<256x16xf32> to vector<16x16xf32>
    %c0_54 = arith.constant 0 : index
    %c13 = arith.constant 13 : index
    %c0_55 = arith.constant 0 : index
    %c0_56 = arith.constant 0 : index
    %67 = vector.load %arg4[%c0_54, %c13, %c0_55, %c0_56] : memref<1x16x16x16xf32, #tpu.memory_space<vmem>>, vector<1x1x16x16xf32>
    %68 = vector.shape_cast %67 : vector<1x1x16x16xf32> to vector<16x16xf32>
    %69 = vector.shape_cast %66 : vector<16x16xf32> to vector<1x1x16x16xf32>
    tpu.vector_store %arg4[%c0_54, %c13, %c0_55, %c0_56], %69 {strides = array<i32>} : memref<1x16x16x16xf32, #tpu.memory_space<vmem>>, vector<1x1x16x16xf32>,
    %70 = vector.extract_strided_slice %13 {offsets = [224, 0], sizes = [16, 16], strides = [1, 1]} : vector<256x16xf32> to vector<16x16xf32>
    %c0_57 = arith.constant 0 : index
    %c14 = arith.constant 14 : index
    %c0_58 = arith.constant 0 : index
    %c0_59 = arith.constant 0 : index
    %71 = vector.load %arg4[%c0_57, %c14, %c0_58, %c0_59] : memref<1x16x16x16xf32, #tpu.memory_space<vmem>>, vector<1x1x16x16xf32>
    %72 = vector.shape_cast %71 : vector<1x1x16x16xf32> to vector<16x16xf32>
    %73 = vector.shape_cast %70 : vector<16x16xf32> to vector<1x1x16x16xf32>
    tpu.vector_store %arg4[%c0_57, %c14, %c0_58, %c0_59], %73 {strides = array<i32>} : memref<1x16x16x16xf32, #tpu.memory_space<vmem>>, vector<1x1x16x16xf32>,
    %74 = vector.extract_strided_slice %13 {offsets = [240, 0], sizes = [16, 16], strides = [1, 1]} : vector<256x16xf32> to vector<16x16xf32>
    %c0_60 = arith.constant 0 : index
    %c15 = arith.constant 15 : index
    %c0_61 = arith.constant 0 : index
    %c0_62 = arith.constant 0 : index
    %75 = vector.load %arg4[%c0_60, %c15, %c0_61, %c0_62] : memref<1x16x16x16xf32, #tpu.memory_space<vmem>>, vector<1x1x16x16xf32>
    %76 = vector.shape_cast %75 : vector<1x1x16x16xf32> to vector<16x16xf32>
    %77 = vector.shape_cast %74 : vector<16x16xf32> to vector<1x1x16x16xf32>
    tpu.vector_store %arg4[%c0_60, %c15, %c0_61, %c0_62], %77 {strides = array<i32>} : memref<1x16x16x16xf32, #tpu.memory_space<vmem>>, vector<1x1x16x16xf32>,
    return
  }
  func.func @transform_0(%arg0: i32, %arg1: i32) -> (i32, i32, i32) {
    %c0_i32 = arith.constant 0 : i32
    %c0_i32_0 = arith.constant 0 : i32
    %c0_i32_1 = arith.constant 0 : i32
    return %arg0, %c0_i32, %c0_i32_0 : i32, i32, i32
  }
  func.func @transform_1(%arg0: i32, %arg1: i32) -> (i32, i32) {
    %c0_i32 = arith.constant 0 : i32
    %c0_i32_0 = arith.constant 0 : i32
    %c0_i32_1 = arith.constant 0 : i32
    return %c0_i32, %c0_i32_0 : i32, i32
  }
  func.func @transform_2(%arg0: i32, %arg1: i32) -> (i32, i32, i32, i32) {
    %c0_i32 = arith.constant 0 : i32
    %c0_i32_0 = arith.constant 0 : i32
    %c0_i32_1 = arith.constant 0 : i32
    return %arg0, %c0_i32, %arg1, %c0_i32_0 : i32, i32, i32, i32
  }
}

</mosaic_0001>

<bundles_post_ra>
// kernel: tpu_custom_call.1
= control target key start
LH: loop header
LB: loop body
LE: loop exit
PB: predicated region body
PF: predicated region fallthrough
CT: control target
= control target key end

     0   :  { %7 = vsyncpa [#allocation3], 0  ;;  %s1234_s0 = inlined_call_operand.vmem [shape: f32[8,24,19], index: 0, kind: input, shape index: {}]   ;;  %s1235_s1 = inlined_call_operand.vmem [shape: f32[256,96], index: 1, kind: input, shape index: {}]   ;;  %s1236_s2 = inlined_call_operand.hbm [shape: f32[8,16,16,16], index: 2, kind: output, shape index: {}]  }
   0x1   :  { %9 = vsyncpa [#allocation3 + $0x1], 0  ;;  %s922_s9 = smov 0   ;;  %s924_s10 = smov 0  }
   0x2   :  { %s926_s11 = smov 0   ;;  %s928_s12 = smov 0  }
   0x3   :  { %s930_s13 = smov 0   ;;  %s932_s14 = smov 0  }
   0x4 LB: > { %s635_s15 = sadd.s32 4294967295, %s900_s14   ;;  %s636_s16 = sadd.s32 4294967294, %s900_s14   ;;  %s900_s14 = sphi %s932_s14, %s15_s14   ;;  %s896_s13 = sphi %s930_s13, %s1243_s13   ;;  %s892_s12 = sphi %s928_s12, %s1242_s12   ;;  %s888_s11 = sphi %s926_s11, %s1241_s11   ;;  %s884_s10 = sphi %s924_s10, %s1240_s10   ;;  %s880_s9 = sphi %s922_s9, %s1239_s9  }
   0x5   : > { %s27_s17 = sadd.s32 1, %s896_s13  ;;  %s83_s18 = sadd.s32 1, %s888_s11 }
   0x6   : > { %p29_p0 = scmp.ge.s32.totalorder %s27_s17, 8  ;;  %p93_p1 = scmp.ne.s32.totalorder %s888_s11, %s884_s10 }
   0x7   : > { %p94_p2 = scmp.eq.s32.totalorder %s635_s15, 7  ;;  %p99_p3 = scmp.ne.s32.totalorder %s884_s10, %s880_s9 }
   0x8   : > { %s1245_s17 = smov (%p29_p0, %s27_s17), 0  ;;  %p100_p5 = scmp.eq.s32.totalorder %s636_s16, 7 }
   0x9   : > { %p962_p4 = por %p94_p2, %p93_p1  ;;  %s78_s20 = ssub.s32 %s896_s13, %s1245_s17 }
   0xa   : > { %p639_p6 = scmp.ge.s32.totalorder %s900_s14, 1  ;;  %p81_p7 = scmp.eq.s32.totalorder %s78_s20, 0 }
   0xb   : > { %p969_p8 = por %p100_p5, %p99_p3  ;;  %p129_p9 = scmp.lt.s32.totalorder %s900_s14, 9 }
   0xc   : > { %s975_s22 = scalar_select %p81_p7, %s888_s11, %s83_s18  }
   0xd   : > { %p130_p10 = pnand %p639_p6, %p129_p9 }
   0xe   : > { %p151_p11 = scmp.lt.s32.totalorder (!%p130_p10), %s892_s12, 7  ;;  %s902_s28 = smov (!%p130_p10), 125  }
   0xf   : > { %133 = sbr.rel (%p130_p10) target bundleno = 368 (0x170), region = 28  ;;  %s903_s29 = smov (!%p130_p10), 126  }
  0x10   : > { %s904_s30 = smov (!%p130_p10), 127   ;;  %s709_s26 = sshll.u32 (!%p130_p10), %s892_s12, 8 }
  0x11   : > { %s842_s8 = scalar_lea.hbm (!%p130_p10), %s1236_s2, 2048 }
  0x14   : > { %s152_s23 = scalar_select %p151_p11, %s892_s12, 7  ;;  %v206_v16 = vld [vmem:[%s1235_s1 + $0x80] sm:$0xff]  ;;  %vm222_vm0 = vcmask 785408   ;;  %v207_v20 = vld [vmem:[%s1235_s1 + $0x88] sm:$0xff]  ;;  %v208_v24 = vld [vmem:[%s1235_s1 + $0x90] sm:$0xff]  ;;  %vm496_vm1 = vcmask 130048  }
  0x15   : > { %v214_v17 = vld [vmem:[%s1235_s1 + $0xc0] sm:$0xff]  ;;  %v215_v21 = vld [vmem:[%s1235_s1 + $0xc8] sm:$0xff]  ;;  %v216_v25 = vld [vmem:[%s1235_s1 + $0xd0] sm:$0xff] }
  0x16   : > { %s746_s24 = smul.u32 24, %s152_s23  ;;  %v190_v18 = vld [vmem:[%s1235_s1] sm:$0xff]  ;;  %v191_v22 = vld [vmem:[%s1235_s1 + $0x8] sm:$0xff]  ;;  %v192_v26 = vld [vmem:[%s1235_s1 + $0x10] sm:$0xff]  ;;  %s148_s23 = sand.u32 1, %s884_s10  }
  0x17   : > { %v198_v19 = vld [vmem:[%s1235_s1 + $0x40] sm:$0xff]  ;;  %v199_v23 = vld [vmem:[%s1235_s1 + $0x48] sm:$0xff]  ;;  %v200_v27 = vld [vmem:[%s1235_s1 + $0x50] sm:$0xff]  ;;  %s545_s3 = scalar_lea.sflag [#allocation3], %s148_s23 }
  0x18   : > { %s155_s27 = scalar_lea.vmem %s1234_s0, %s746_s24  ;;  %v209_v28 = vld [vmem:[%s1235_s1 + $0x98] sm:$0xff]  ;;  %v210_v32 = vld [vmem:[%s1235_s1 + $0xa0] sm:$0xff]  ;;  %v211_v36 = vld [vmem:[%s1235_s1 + $0xa8] sm:$0xff]  ;;  %s640_s24 = sshll.u32 %s148_s23, 8 }
  0x19   : > { %v982_v0 = vld [vmem:[%s155_s27 + $0x8] sm:$0xff]  ;;  %v159_v1 = vld [vmem:[%s155_s27 + $0x10] sm:$0xff]  ;;  %v985_v3 = vld [vmem:[%s155_s27] sm:$0xff]  ;;  %s1129_s25 = scalar_lea.vmem [#allocation2], %s640_s24 }
  0x1a   : > { %v807_v2 = vpack.i.bf16 %v982_v0, %v159_v1  ;;  %v217_v29 = vld [vmem:[%s1235_s1 + $0xd8] sm:$0xff]  ;;  %v218_v33 = vld [vmem:[%s1235_s1 + $0xe0] sm:$0xff]  ;;  %v219_v37 = vld [vmem:[%s1235_s1 + $0xe8] sm:$0xff]  ;;  %s559_s12 = sshll.u32 %s1129_s25, 4  ;;  %s560_s12 = int_to_ptr.vmem [resolvable:$true] %s559_s12 }
  0x1b   : > { %v193_v30 = vld [vmem:[%s1235_s1 + $0x18] sm:$0xff]  ;;  %v194_v34 = vld [vmem:[%s1235_s1 + $0x20] sm:$0xff]  ;;  %v195_v38 = vld [vmem:[%s1235_s1 + $0x28] sm:$0xff] }
  0x1c   : > { %808 = vrot.lane.b32.xlu0 %v807_v2, %s902_s28  ;;  %813 = vrot.lane.b32.xlu1 %v807_v2, %s903_s29  ;;  %v201_v31 = vld [vmem:[%s1235_s1 + $0x58] sm:$0xff]  ;;  %v202_v35 = vld [vmem:[%s1235_s1 + $0x60] sm:$0xff] }
  0x1d   : > { %818 = vrot.lane.b32.xlu2 %v807_v2, %s904_s30  ;;  %v203_v39 = vld [vmem:[%s1235_s1 + $0x68] sm:$0xff]  ;;  %v212_v40 = vld [vmem:[%s1235_s1 + $0xb0] sm:$0xff]  ;;  %v213_v44 = vld [vmem:[%s1235_s1 + $0xb8] sm:$0xff] }
  0x1e   : > { %v220_v41 = vld [vmem:[%s1235_s1 + $0xf0] sm:$0xff]  ;;  %v221_v45 = vld [vmem:[%s1235_s1 + $0xf8] sm:$0xff] }
  0x1f   : > { %v196_v42 = vld [vmem:[%s1235_s1 + $0x30] sm:$0xff]  ;;  %v197_v46 = vld [vmem:[%s1235_s1 + $0x38] sm:$0xff] }
  0x20   : > { %v204_v43 = vld [vmem:[%s1235_s1 + $0x70] sm:$0xff]  ;;  %v205_v47 = vld [vmem:[%s1235_s1 + $0x78] sm:$0xff] }
  0x24   : > { %181 = vrot.lane.b32.xlu0 %v985_v3, %s902_s28  ;;  %172 = vrot.lane.b32.xlu1 %v985_v3, %s903_s29  ;;  %s558_s29 = scalar_lea.hbm %s1236_s2, %s709_s26 }
  0x25   : > { %163 = vrot.lane.b32.xlu2 %v985_v3, %s904_s30  ;;  %s561_s30 = sshll.u32 %s558_s29, 4  ;;  %s562_s30 = int_to_ptr.hbm [resolvable:$true] %s561_s30 }
  0x26   : > { %s836_s4 = sshra.s32 %s562_s30, 4  ;;  %s837_s4 = int_to_ptr.hbm [resolvable:$true] %s836_s4 }
  0x27   : > { %s838_s5 = scalar_lea.hbm %s837_s4, 256  ;;  %p843_p1 = scmp.lt.s32.totalorder %s837_s4, %s1236_s2 }
  0x28   : > { %p839_p12 = scmp.ne.s32.totalorder %s837_s4, %s838_s5  ;;  %p844_p2 = scmp.lt.s32.totalorder %s842_s8, %s838_s5 }
  0x2a   : > { %p840_p13 = pnand %p839_p12, %p962_p4  ;;  %p845_p3 = por %p844_p2, %p843_p1 }
  0x2c   : > { %p841_p0 = pneg %p840_p13 }
  0x2e   : > { %p846_p5 = pnand %p845_p3, %p841_p0 }
  0x77   : > { %v819_v9 = vpop.permute.xlu2 %818 }
  0x78   : > { %v820_v13 = vunpack.i.l.bf16 %v819_v9  ;;  %v821_v14 = vunpack.i.h.bf16 %v819_v9 }
  0x7f   : > { %v164_v15 = vpop.permute.xlu2 %163 }
  0x8e   : > { %v809_v4 = vpop.permute.xlu0 %808  ;;  %v814_v6 = vpop.permute.xlu1 %813 }
  0x8f   : > { %v810_v5 = vunpack.i.l.bf16 %v809_v4  ;;  %v811_v7 = vunpack.i.h.bf16 %v809_v4  ;;  %v815_v10 = vunpack.i.l.bf16 %v814_v6  ;;  %v816_v11 = vunpack.i.h.bf16 %v814_v6 }
  0x91   : > { %323 = vmatpush.msra.mxu0 %v810_v5  ;;  %710 = vmatpush.msra.mxu1 %v810_v5 }
  0x92   : > { %711 = vmatpush.msra.mxu2 %v810_v5  ;;  %712 = vmatpush.msra.mxu3 %v810_v5 }
  0x93   : > { %324 = vmatpush.msra.mxu0 %v811_v7  ;;  %713 = vmatpush.msra.mxu1 %v811_v7 }
  0x94   : > { %714 = vmatpush.msra.mxu2 %v811_v7  ;;  %715 = vmatpush.msra.mxu3 %v811_v7 }
  0x96   : > { %v182_v8 = vpop.permute.xlu0 %181  ;;  %v173_v12 = vpop.permute.xlu1 %172 }
  0x97   : > { %325 = vmatpush.msra.mxu0 %v182_v8  ;;  %716 = vmatpush.msra.mxu1 %v182_v8 }
  0x98   : > { %717 = vmatpush.msra.mxu2 %v182_v8  ;;  %718 = vmatpush.msra.mxu3 %v182_v8 }
  0x99   : > { %326 = vmatpush.msra.mxu0 %v815_v10  ;;  %719 = vmatpush.msra.mxu1 %v815_v10 }
  0x9a   : > { %720 = vmatpush.msra.mxu2 %v815_v10  ;;  %721 = vmatpush.msra.mxu3 %v815_v10 }
  0x9b   : > { %327 = vmatpush.msra.mxu0 %v816_v11  ;;  %722 = vmatpush.msra.mxu1 %v816_v11 }
  0x9c   : > { %723 = vmatpush.msra.mxu2 %v816_v11  ;;  %724 = vmatpush.msra.mxu3 %v816_v11 }
  0x9d   : > { %328 = vmatpush.msra.mxu0 %v173_v12  ;;  %725 = vmatpush.msra.mxu1 %v173_v12 }
  0x9e   : > { %726 = vmatpush.msra.mxu2 %v173_v12  ;;  %727 = vmatpush.msra.mxu3 %v173_v12 }
  0x9f   : > { %329 = vmatpush.msra.mxu0 %v820_v13  ;;  %728 = vmatpush.msra.mxu1 %v820_v13 }
  0xa0   : > { %729 = vmatpush.msra.mxu2 %v820_v13  ;;  %730 = vmatpush.msra.mxu3 %v820_v13 }
  0xa1   : > { %330 = vmatpush.msra.mxu0 %v821_v14  ;;  %731 = vmatpush.msra.mxu1 %v821_v14 }
  0xa2   : > { %732 = vmatpush.msra.mxu2 %v821_v14  ;;  %733 = vmatpush.msra.mxu3 %v821_v14 }
  0xa3   : > { %331 = vmatpush.msra.mxu0 %v164_v15  ;;  %734 = vmatpush.msra.mxu1 %v164_v15 }
  0xa4   : > { %735 = vmatpush.msra.mxu2 %v164_v15  ;;  %736 = vmatpush.msra.mxu3 %v164_v15 }
  0xa5   : > { %332 = vmatpush.msra.mxu0 %v159_v1  ;;  %737 = vmatpush.msra.mxu1 %v159_v1 }
  0xa6   : > { %738 = vmatpush.msra.mxu2 %v159_v1  ;;  %739 = vmatpush.msra.mxu3 %v159_v1 }
  0xa7   : > { %333 = vmatpush.msra.mxu0 %v982_v0  ;;  %740 = vmatpush.msra.mxu1 %v982_v0 }
  0xa8   : > { %741 = vmatpush.msra.mxu2 %v982_v0  ;;  %742 = vmatpush.msra.mxu3 %v982_v0 }
  0xa9   : > { %334 = vmatpush.msra.mxu0 %v985_v3  ;;  %743 = vmatpush.msra.mxu1 %v985_v3 }
  0xaa   : > { %744 = vmatpush.msra.mxu2 %v985_v3  ;;  %745 = vmatpush.msra.mxu3 %v985_v3 }
  0xab   : > { %658 = vmatmul.msk.f32.vlgmr.msra.gmra.mxu2 %vm222_vm0, %v206_v16  ;;  %666 = vmatmul.msk.f32.vlgmr.msra.gmra.mxu3 %vm222_vm0, %v214_v17 }
  0xac   : > { %642 = vmatmul.msk.f32.vlgmr.msra.gmra.mxu0 %vm222_vm0, %v190_v18  ;;  %650 = vmatmul.msk.f32.vlgmr.msra.gmra.mxu1 %vm222_vm0, %v198_v19 }
  0xb3   : > { %659 = vmatmul.msk.f32.gmra.mxu2 %vm222_vm0, %v207_v20  ;;  %667 = vmatmul.msk.f32.gmra.mxu3 %vm222_vm0, %v215_v21 }
  0xb4   : > { %643 = vmatmul.msk.f32.gmra.mxu0 %vm222_vm0, %v191_v22  ;;  %651 = vmatmul.msk.f32.gmra.mxu1 %vm222_vm0, %v199_v23 }
  0xbb   : > { %660 = vmatmul.msk.f32.gmra.mxu2 %vm222_vm0, %v208_v24  ;;  %668 = vmatmul.msk.f32.gmra.mxu3 %vm222_vm0, %v216_v25 }
  0xbc   : > { %644 = vmatmul.msk.f32.gmra.mxu0 %vm222_vm0, %v192_v26  ;;  %652 = vmatmul.msk.f32.gmra.mxu1 %vm222_vm0, %v200_v27 }
  0xc3   : > { %661 = vmatmul.msk.f32.gmra.mxu2 %vm222_vm0, %v209_v28  ;;  %669 = vmatmul.msk.f32.gmra.mxu3 %vm222_vm0, %v217_v29 }
  0xc4   : > { %645 = vmatmul.msk.f32.gmra.mxu0 %vm222_vm0, %v193_v30  ;;  %653 = vmatmul.msk.f32.gmra.mxu1 %vm222_vm0, %v201_v31 }
  0xcb   : > { %662 = vmatmul.msk.f32.gmra.mxu2 %vm222_vm0, %v210_v32  ;;  %670 = vmatmul.msk.f32.gmra.mxu3 %vm222_vm0, %v218_v33 }
  0xcc   : > { %646 = vmatmul.msk.f32.gmra.mxu0 %vm222_vm0, %v194_v34  ;;  %654 = vmatmul.msk.f32.gmra.mxu1 %vm222_vm0, %v202_v35 }
  0xd3   : > { %663 = vmatmul.msk.f32.gmra.mxu2 %vm222_vm0, %v211_v36  ;;  %671 = vmatmul.msk.f32.gmra.mxu3 %vm222_vm0, %v219_v37 }
  0xd4   : > { %647 = vmatmul.msk.f32.gmra.mxu0 %vm222_vm0, %v195_v38  ;;  %655 = vmatmul.msk.f32.gmra.mxu1 %vm222_vm0, %v203_v39 }
  0xdb   : > { %664 = vmatmul.msk.f32.gmra.mxu2 %vm222_vm0, %v212_v40  ;;  %672 = vmatmul.msk.f32.gmra.mxu3 %vm222_vm0, %v220_v41 }
  0xdc   : > { %648 = vmatmul.msk.f32.gmra.mxu0 %vm222_vm0, %v196_v42  ;;  %656 = vmatmul.msk.f32.gmra.mxu1 %vm222_vm0, %v204_v43 }
  0xe3   : > { %665 = vmatmul.msk.f32.gmra.mxu2 %vm222_vm0, %v213_v44  ;;  %673 = vmatmul.msk.f32.gmra.mxu3 %vm222_vm0, %v221_v45 }
  0xe4   : > { %649 = vmatmul.msk.f32.gmra.mxu0 %vm222_vm0, %v197_v46  ;;  %657 = vmatmul.msk.f32.gmra.mxu1 %vm222_vm0, %v205_v47 }
 0x129   : > { %v336_v48 = vpop.f32.mrf.mxu0  ;;  %v360_v49 = vpop.f32.mrf.mxu1 }
 0x12a   : > { %v432_v50 = vand.u32 2147483647, %v336_v48  ;;  %v440_v51 = vand.u32 2147483647, %v360_v49 }
 0x12c   : > { %v464_v52 = vmin.f32 %v432_v50, 8.0  ;;  %v472_v53 = vmin.f32 %v440_v51, 8.0 }
 0x12e   : > { %497 = vst.msk [vmem:[%s1129_s25] sm:$0xff] %vm496_vm1, %v464_v52  ;;  %v384_v54 = vpop.f32.mrf.mxu2  ;;  %v408_v55 = vpop.f32.mrf.mxu3 }
 0x12f   : > { %680 = vst.msk [vmem:[%s1129_s25 + $0x40] sm:$0xff] %vm496_vm1, %v472_v53  ;;  %v448_v56 = vand.u32 2147483647, %v384_v54  ;;  %v456_v57 = vand.u32 2147483647, %v408_v55 }
 0x131   : > { %v480_v58 = vmin.f32 %v448_v56, 8.0  ;;  %v488_v59 = vmin.f32 %v456_v57, 8.0  ;;  %v339_v60 = vpop.f32.mrf.mxu0  ;;  %v363_v61 = vpop.f32.mrf.mxu1 }
 0x132   : > { %v433_v62 = vand.u32 2147483647, %v339_v60  ;;  %v441_v63 = vand.u32 2147483647, %v363_v61 }
 0x133   : > { %688 = vst.msk [vmem:[%s1129_s25 + $0x80] sm:$0xff] %vm496_vm1, %v480_v58 }
 0x134   : > { %696 = vst.msk [vmem:[%s1129_s25 + $0xc0] sm:$0xff] %vm496_vm1, %v488_v59  ;;  %v465_v0 = vmin.f32 %v433_v62, 8.0  ;;  %v473_v1 = vmin.f32 %v441_v63, 8.0 }
 0x136   : > { %498 = vst.msk [vmem:[%s1129_s25 + $0x8] sm:$0xff] %vm496_vm1, %v465_v0  ;;  %v387_v2 = vpop.f32.mrf.mxu2  ;;  %v411_v3 = vpop.f32.mrf.mxu3 }
 0x137   : > { %681 = vst.msk [vmem:[%s1129_s25 + $0x48] sm:$0xff] %vm496_vm1, %v473_v1  ;;  %v449_v4 = vand.u32 2147483647, %v387_v2  ;;  %v457_v5 = vand.u32 2147483647, %v411_v3 }
 0x139   : > { %v481_v6 = vmin.f32 %v449_v4, 8.0  ;;  %v489_v7 = vmin.f32 %v457_v5, 8.0  ;;  %v342_v8 = vpop.f32.mrf.mxu0  ;;  %v366_v9 = vpop.f32.mrf.mxu1 }
 0x13a   : > { %v434_v10 = vand.u32 2147483647, %v342_v8  ;;  %v442_v11 = vand.u32 2147483647, %v366_v9 }
 0x13b   : > { %689 = vst.msk [vmem:[%s1129_s25 + $0x88] sm:$0xff] %vm496_vm1, %v481_v6 }
 0x13c   : > { %697 = vst.msk [vmem:[%s1129_s25 + $0xc8] sm:$0xff] %vm496_vm1, %v489_v7  ;;  %v466_v12 = vmin.f32 %v434_v10, 8.0  ;;  %v474_v13 = vmin.f32 %v442_v11, 8.0 }
 0x13e   : > { %674 = vst.msk [vmem:[%s1129_s25 + $0x10] sm:$0xff] %vm496_vm1, %v466_v12  ;;  %v390_v14 = vpop.f32.mrf.mxu2  ;;  %v414_v15 = vpop.f32.mrf.mxu3 }
 0x13f   : > { %682 = vst.msk [vmem:[%s1129_s25 + $0x50] sm:$0xff] %vm496_vm1, %v474_v13  ;;  %v450_v16 = vand.u32 2147483647, %v390_v14  ;;  %v458_v17 = vand.u32 2147483647, %v414_v15 }
 0x141   : > { %v482_v18 = vmin.f32 %v450_v16, 8.0  ;;  %v490_v19 = vmin.f32 %v458_v17, 8.0  ;;  %v345_v20 = vpop.f32.mrf.mxu0  ;;  %v369_v21 = vpop.f32.mrf.mxu1 }
 0x142   : > { %v435_v22 = vand.u32 2147483647, %v345_v20  ;;  %v443_v23 = vand.u32 2147483647, %v369_v21 }
 0x143   : > { %690 = vst.msk [vmem:[%s1129_s25 + $0x90] sm:$0xff] %vm496_vm1, %v482_v18 }
 0x144   : > { %698 = vst.msk [vmem:[%s1129_s25 + $0xd0] sm:$0xff] %vm496_vm1, %v490_v19  ;;  %v467_v24 = vmin.f32 %v435_v22, 8.0  ;;  %v475_v25 = vmin.f32 %v443_v23, 8.0 }
 0x146   : > { %675 = vst.msk [vmem:[%s1129_s25 + $0x18] sm:$0xff] %vm496_vm1, %v467_v24  ;;  %v393_v26 = vpop.f32.mrf.mxu2  ;;  %v417_v27 = vpop.f32.mrf.mxu3 }
 0x147   : > { %683 = vst.msk [vmem:[%s1129_s25 + $0x58] sm:$0xff] %vm496_vm1, %v475_v25  ;;  %v451_v28 = vand.u32 2147483647, %v393_v26  ;;  %v459_v29 = vand.u32 2147483647, %v417_v27 }
 0x149   : > { %v483_v30 = vmin.f32 %v451_v28, 8.0  ;;  %v491_v31 = vmin.f32 %v459_v29, 8.0  ;;  %v348_v32 = vpop.f32.mrf.mxu0  ;;  %v372_v33 = vpop.f32.mrf.mxu1 }
 0x14a   : > { %v436_v34 = vand.u32 2147483647, %v348_v32  ;;  %v444_v35 = vand.u32 2147483647, %v372_v33 }
 0x14b   : > { %691 = vst.msk [vmem:[%s1129_s25 + $0x98] sm:$0xff] %vm496_vm1, %v483_v30 }
 0x14c   : > { %699 = vst.msk [vmem:[%s1129_s25 + $0xd8] sm:$0xff] %vm496_vm1, %v491_v31  ;;  %v468_v36 = vmin.f32 %v436_v34, 8.0  ;;  %v476_v37 = vmin.f32 %v444_v35, 8.0 }
 0x14e   : > { %676 = vst.msk [vmem:[%s1129_s25 + $0x20] sm:$0xff] %vm496_vm1, %v468_v36  ;;  %v396_v38 = vpop.f32.mrf.mxu2  ;;  %v420_v39 = vpop.f32.mrf.mxu3 }
 0x14f   : > { %684 = vst.msk [vmem:[%s1129_s25 + $0x60] sm:$0xff] %vm496_vm1, %v476_v37  ;;  %v452_v40 = vand.u32 2147483647, %v396_v38  ;;  %v460_v41 = vand.u32 2147483647, %v420_v39 }
 0x151   : > { %v484_v42 = vmin.f32 %v452_v40, 8.0  ;;  %v492_v43 = vmin.f32 %v460_v41, 8.0  ;;  %v351_v44 = vpop.f32.mrf.mxu0  ;;  %v375_v45 = vpop.f32.mrf.mxu1 }
 0x152   : > { %v437_v46 = vand.u32 2147483647, %v351_v44  ;;  %v445_v47 = vand.u32 2147483647, %v375_v45 }
 0x153   : > { %692 = vst.msk [vmem:[%s1129_s25 + $0xa0] sm:$0xff] %vm496_vm1, %v484_v42 }
 0x154   : > { %700 = vst.msk [vmem:[%s1129_s25 + $0xe0] sm:$0xff] %vm496_vm1, %v492_v43  ;;  %v469_v48 = vmin.f32 %v437_v46, 8.0  ;;  %v477_v49 = vmin.f32 %v445_v47, 8.0 }
 0x156   : > { %677 = vst.msk [vmem:[%s1129_s25 + $0x28] sm:$0xff] %vm496_vm1, %v469_v48  ;;  %v399_v50 = vpop.f32.mrf.mxu2  ;;  %v423_v51 = vpop.f32.mrf.mxu3 }
 0x157   : > { %685 = vst.msk [vmem:[%s1129_s25 + $0x68] sm:$0xff] %vm496_vm1, %v477_v49  ;;  %v453_v52 = vand.u32 2147483647, %v399_v50  ;;  %v461_v53 = vand.u32 2147483647, %v423_v51 }
 0x159   : > { %v485_v54 = vmin.f32 %v453_v52, 8.0  ;;  %v493_v55 = vmin.f32 %v461_v53, 8.0  ;;  %v354_v56 = vpop.f32.mrf.mxu0  ;;  %v378_v57 = vpop.f32.mrf.mxu1 }
 0x15a   : > { %v438_v58 = vand.u32 2147483647, %v354_v56  ;;  %v446_v59 = vand.u32 2147483647, %v378_v57 }
 0x15b   : > { %693 = vst.msk [vmem:[%s1129_s25 + $0xa8] sm:$0xff] %vm496_vm1, %v485_v54 }
 0x15c   : > { %701 = vst.msk [vmem:[%s1129_s25 + $0xe8] sm:$0xff] %vm496_vm1, %v493_v55  ;;  %v470_v60 = vmin.f32 %v438_v58, 8.0  ;;  %v478_v61 = vmin.f32 %v446_v59, 8.0 }
 0x15e   : > { %678 = vst.msk [vmem:[%s1129_s25 + $0x30] sm:$0xff] %vm496_vm1, %v470_v60  ;;  %v402_v62 = vpop.f32.mrf.mxu2  ;;  %v426_v63 = vpop.f32.mrf.mxu3 }
 0x15f   : > { %686 = vst.msk [vmem:[%s1129_s25 + $0x70] sm:$0xff] %vm496_vm1, %v478_v61  ;;  %v454_v0 = vand.u32 2147483647, %v402_v62  ;;  %v462_v1 = vand.u32 2147483647, %v426_v63 }
 0x161   : > { %v486_v2 = vmin.f32 %v454_v0, 8.0  ;;  %v494_v3 = vmin.f32 %v462_v1, 8.0  ;;  %v357_v4 = vpop.f32.mrf.mxu0  ;;  %v381_v5 = vpop.f32.mrf.mxu1 }
 0x162   : > { %v439_v6 = vand.u32 2147483647, %v357_v4  ;;  %v447_v7 = vand.u32 2147483647, %v381_v5 }
 0x163   : > { %694 = vst.msk [vmem:[%s1129_s25 + $0xb0] sm:$0xff] %vm496_vm1, %v486_v2 }
 0x164   : > { %702 = vst.msk [vmem:[%s1129_s25 + $0xf0] sm:$0xff] %vm496_vm1, %v494_v3  ;;  %v471_v8 = vmin.f32 %v439_v6, 8.0  ;;  %v479_v9 = vmin.f32 %v447_v7, 8.0 }
 0x166   : > { %679 = vst.msk [vmem:[%s1129_s25 + $0x38] sm:$0xff] %vm496_vm1, %v471_v8  ;;  %v405_v10 = vpop.f32.mrf.mxu2  ;;  %v429_v11 = vpop.f32.mrf.mxu3 }
 0x167   : > { %687 = vst.msk [vmem:[%s1129_s25 + $0x78] sm:$0xff] %vm496_vm1, %v479_v9  ;;  %v455_v12 = vand.u32 2147483647, %v405_v10  ;;  %v463_v13 = vand.u32 2147483647, %v429_v11 }
 0x169   : > { %v487_v14 = vmin.f32 %v455_v12, 8.0  ;;  %v495_v15 = vmin.f32 %v463_v13, 8.0 }
 0x16b   : > { %695 = vst.msk [vmem:[%s1129_s25 + $0xb8] sm:$0xff] %vm496_vm1, %v487_v14 }
 0x16c   : > { %703 = vst.msk [vmem:[%s1129_s25 + $0xf8] sm:$0xff] %vm496_vm1, %v495_v15 }
 0x16d   : > { %849 = shalt.err (!%p846_p5)
}
 0x16e   : > { %s905_s18 = smov 128   ;;  %s906_s20 = smov 8  }
 0x16f   : > { %747 = dma.vmem_to_hbm [thread:$0]  (%p962_p4), %s560_s12, 4096, %s562_s30, %s545_s3, %s905_s18, %s905_s18, %s906_s20  }
 0x170 PF: > { %p753_p6 = scmp.ge.s32.totalorder %s900_s14, 2  ;;  %s576_s23 = sand.u32 1, %s880_s9  }
 0x171   : > { %s577_s24 = scalar_lea.sflag [#allocation3], %s576_s23 }
 0x172   : > { %p750_p7 = pnand %p753_p6, %p969_p8 }
 0x174   : > { %p751_p9 = pneg %p750_p7 }
 0x176   : > { %875 = dma.done.wait (%p751_p9), %s577_s24, 4096  }
 0x177   : > { %877 = vsyncadd (%p751_p9), %s577_s24, 4294963200  ;;  %s15_s14 = sadd.s32 1, %s900_s14   ;;  %s1239_s9 = smov %s884_s10 }
 0x178   : > { %p12_p10 = scmp.ge.s32.totalorder %s15_s14, 10   ;;  %s1240_s10 = smov %s888_s11 }
 0x179   : > { %s1241_s11 = smov %s975_s22  ;;  %s1242_s12 = smov %s896_s13 }
 0x17a   : > { %s1243_s13 = smov %s1245_s17  ;;  %14 = sbr.rel (!%p12_p10) target bundleno = 4 (0x4), region = 78 }
 0x17f   :  { %583 = vsyncpa [#allocation3], 1 }
 0x180   :  { %585 = vsyncpa [#allocation3 + $0x1], 1 }

</bundles_post_ra>
